<compile_context>
chip_gen: v7x
topology: tpu7x:2x2x1
jax: 0.10.0
libtpu: 0.0.40
codegen_flags: <defaults>
</compile_context>

<pallas_src>
import jax
import jax.numpy as jnp
from jax.experimental import pallas as pl
from jax.experimental.pallas import tpu as pltpu

# Layer sizes of the PyTorch module: 8 -> 6 -> 4 -> 1
DIMS = (8, 6, 4, 1)


def mlp_kernel(w1_ref, b1_ref, w2_ref, b2_ref, w3_ref, b3_ref, x_ref, o_ref):
    """One lane-dense batch tile of
         y^T = sig(W3^T @ sig(W2^T @ sig(W1^T @ x^T + b1) + b2) + b3)

    x_ref : (8, TILE_N) VMEM   -- batch in lanes
    w*/b* : tiny SMEM arrays   -- read as scalars, broadcast into VPU FMAs
    o_ref : (1, TILE_N) VMEM   -- lane-dense output tile
    """
    x = x_ref[...].astype(jnp.float32)                    # (8, TILE_N)
    rows = [x[k:k + 1, :] for k in range(DIMS[0])]        # eight (1, TILE_N) rows

    def layer(in_rows, w_ref, b_ref, n_in, n_out):
        out_rows = []
        for o in range(n_out):
            acc = in_rows[0] * w_ref[0, o]
            for k in range(1, n_in):
                acc = acc + in_rows[k] * w_ref[k, o]
            out_rows.append(jax.nn.sigmoid(acc + b_ref[o]))
        return out_rows

    rows = layer(rows, w1_ref, b1_ref, DIMS[0], DIMS[1])  # (6 rows)
    rows = layer(rows, w2_ref, b2_ref, DIMS[1], DIMS[2])  # (4 rows)
    rows = layer(rows, w3_ref, b3_ref, DIMS[2], DIMS[3])  # (1 row)
    o_ref[...] = rows[0].astype(o_ref.dtype)


def diabetes_logistic_forward(x, params, *, tile_n=8192):
    """x: (N, 8) float32 -> (N, 1) float32, matching the PyTorch forward."""
    w1, b1, w2, b2, w3, b3 = params
    n = x.shape[0]

    # Lane-aligned tiling of the batch; cap the tile at the (128-rounded) batch
    # so small inputs don't over-pad.  tile_n stays a multiple of 128.
    tile_n = min(tile_n, ((n + 127) // 128) * 128)
    n_pad = ((n + tile_n - 1) // tile_n) * tile_n
    grid = (n_pad // tile_n,)

    # Batch-in-lanes layout: (8, n_pad), zero-padded tail (harmless; sliced off).
    xt = jnp.zeros((DIMS[0], n_pad), jnp.float32).at[:, :n].set(
        x.astype(jnp.float32).T)

    smem = pltpu.MemorySpace.SMEM
    weight_specs = [
        pl.BlockSpec(p.shape, (lambda i, _nd=p.ndim: (0,) * _nd),
                     memory_space=smem)
        for p in (w1, b1, w2, b2, w3, b3)
    ]

    flops = 2 * n_pad * (8 * 6 + 6 * 4 + 4 * 1)
    transcendentals = n_pad * (6 + 4 + 1)
    bytes_accessed = 4 * n_pad * (DIMS[0] + DIMS[-1]) + sum(
        4 * int(p.size) for p in (w1, b1, w2, b2, w3, b3))

    out = pl.pallas_call(
        mlp_kernel,
        grid=grid,
        in_specs=weight_specs + [
            pl.BlockSpec((DIMS[0], tile_n), lambda i: (0, i)),
        ],
        out_specs=pl.BlockSpec((DIMS[-1], tile_n), lambda i: (0, i)),
        out_shape=jax.ShapeDtypeStruct((DIMS[-1], n_pad), jnp.float32),
        compiler_params=pltpu.CompilerParams(
            dimension_semantics=("parallel",)),
        cost_estimate=pl.CostEstimate(
            flops=flops,
            transcendentals=transcendentals,
            bytes_accessed=bytes_accessed),
    )(w1, b1, w2, b2, w3, b3, xt)

    # Back to the PyTorch (N, 1) layout.
    return out[0, :n][:, None]


def init_params(key):
    # Deterministic synthetic init mirroring torch.nn.Linear's
    # uniform(-1/sqrt(fan_in), 1/sqrt(fan_in)) scheme.
    # Weights stored as (in_features, out_features) so x @ W + b matches
    # PyTorch's Linear (which does x @ W.T with W of shape (out, in)).
    params = []
    for fan_in, fan_out in zip(DIMS[:-1], DIMS[1:]):
        key, kw, kb = jax.random.split(key, 3)
        bound = 1.0 / jnp.sqrt(float(fan_in))
        w = jax.random.uniform(kw, (fan_in, fan_out), jnp.float32, -bound, bound)
        b = jax.random.uniform(kb, (fan_out,), jnp.float32, -bound, bound)
        params.extend([w, b])
    return tuple(params)


def reference_forward(x, params):
    w1, b1, w2, b2, w3, b3 = params
    h1 = jax.nn.sigmoid(x @ w1 + b1)
    h2 = jax.nn.sigmoid(h1 @ w2 + b2)
    return jax.nn.sigmoid(h2 @ w3 + b3)


if __name__ == "__main__":
    key = jax.random.PRNGKey(0)
    kx, kp = jax.random.split(key)
    batch = 16  # not a multiple of 128 -> exercises the padded-tail path
    x = jax.random.normal(kx, (batch, 8), jnp.float32)
    params = init_params(kp)

    y = diabetes_logistic_forward(x, params)
    jax.block_until_ready(y)

    y_ref = reference_forward(x, params)
    assert y.shape == (batch, 1)
    assert jnp.allclose(y, y_ref, atol=1e-5, rtol=1e-5)
    print("KERNEL_OK")
</pallas_src>

<mosaic_0001>
module attributes {stable_mosaic.version = 11 : i64} {
  func.func @mlp_kernel(%arg0: i32, %arg1: memref<8x6xf32, #tpu.memory_space<smem>>, %arg2: memref<6xf32, #tpu.memory_space<smem>>, %arg3: memref<6x4xf32, #tpu.memory_space<smem>>, %arg4: memref<4xf32, #tpu.memory_space<smem>>, %arg5: memref<4x1xf32, #tpu.memory_space<smem>>, %arg6: memref<1xf32, #tpu.memory_space<smem>>, %arg7: memref<8x128xf32, #tpu.memory_space<vmem>>, %arg8: memref<1x128xf32, #tpu.memory_space<vmem>>) attributes {dimension_semantics = [#tpu.dimension_semantics<parallel>], iteration_bounds = array<i64: 1>, scalar_prefetch = 0 : i64, scratch_operands = 0 : i64, tpu.core_type = #tpu.core_type<tc>, window_params = [{transform_indices = @transform_0, window_bounds = array<i64: 8, 6>}, {transform_indices = @transform_1, window_bounds = array<i64: 6>}, {transform_indices = @transform_2, window_bounds = array<i64: 6, 4>}, {transform_indices = @transform_3, window_bounds = array<i64: 4>}, {transform_indices = @transform_4, window_bounds = array<i64: 4, 1>}, {transform_indices = @transform_5, window_bounds = array<i64: 1>}, {transform_indices = @transform_6, window_bounds = array<i64: 8, 128>}, {transform_indices = @transform_7, window_bounds = array<i64: 1, 128>}]} {
    %c0 = arith.constant 0 : index
    %c0_0 = arith.constant 0 : index
    %0 = vector.load %arg7[%c0, %c0_0] : memref<8x128xf32, #tpu.memory_space<vmem>>, vector<8x128xf32>
    %1 = vector.extract_strided_slice %0 {offsets = [0, 0], sizes = [1, 128], strides = [1, 1]} : vector<8x128xf32> to vector<1x128xf32>
    %2 = vector.extract_strided_slice %0 {offsets = [1, 0], sizes = [1, 128], strides = [1, 1]} : vector<8x128xf32> to vector<1x128xf32>
    %3 = vector.extract_strided_slice %0 {offsets = [2, 0], sizes = [1, 128], strides = [1, 1]} : vector<8x128xf32> to vector<1x128xf32>
    %4 = vector.extract_strided_slice %0 {offsets = [3, 0], sizes = [1, 128], strides = [1, 1]} : vector<8x128xf32> to vector<1x128xf32>
    %5 = vector.extract_strided_slice %0 {offsets = [4, 0], sizes = [1, 128], strides = [1, 1]} : vector<8x128xf32> to vector<1x128xf32>
    %6 = vector.extract_strided_slice %0 {offsets = [5, 0], sizes = [1, 128], strides = [1, 1]} : vector<8x128xf32> to vector<1x128xf32>
    %7 = vector.extract_strided_slice %0 {offsets = [6, 0], sizes = [1, 128], strides = [1, 1]} : vector<8x128xf32> to vector<1x128xf32>
    %8 = vector.extract_strided_slice %0 {offsets = [7, 0], sizes = [1, 128], strides = [1, 1]} : vector<8x128xf32> to vector<1x128xf32>
    %c0_1 = arith.constant 0 : index
    %c0_2 = arith.constant 0 : index
    %9 = memref.load %arg1[%c0_1, %c0_2] : memref<8x6xf32, #tpu.memory_space<smem>>
    %10 = vector.broadcast %9 : f32 to vector<1x128xf32>
    %11 = arith.mulf %1, %10 : vector<1x128xf32>
    %c1 = arith.constant 1 : index
    %c0_3 = arith.constant 0 : index
    %12 = memref.load %arg1[%c1, %c0_3] : memref<8x6xf32, #tpu.memory_space<smem>>
    %13 = vector.broadcast %12 : f32 to vector<1x128xf32>
    %14 = arith.mulf %2, %13 : vector<1x128xf32>
    %15 = arith.addf %11, %14 : vector<1x128xf32>
    %c2 = arith.constant 2 : index
    %c0_4 = arith.constant 0 : index
    %16 = memref.load %arg1[%c2, %c0_4] : memref<8x6xf32, #tpu.memory_space<smem>>
    %17 = vector.broadcast %16 : f32 to vector<1x128xf32>
    %18 = arith.mulf %3, %17 : vector<1x128xf32>
    %19 = arith.addf %15, %18 : vector<1x128xf32>
    %c3 = arith.constant 3 : index
    %c0_5 = arith.constant 0 : index
    %20 = memref.load %arg1[%c3, %c0_5] : memref<8x6xf32, #tpu.memory_space<smem>>
    %21 = vector.broadcast %20 : f32 to vector<1x128xf32>
    %22 = arith.mulf %4, %21 : vector<1x128xf32>
    %23 = arith.addf %19, %22 : vector<1x128xf32>
    %c4 = arith.constant 4 : index
    %c0_6 = arith.constant 0 : index
    %24 = memref.load %arg1[%c4, %c0_6] : memref<8x6xf32, #tpu.memory_space<smem>>
    %25 = vector.broadcast %24 : f32 to vector<1x128xf32>
    %26 = arith.mulf %5, %25 : vector<1x128xf32>
    %27 = arith.addf %23, %26 : vector<1x128xf32>
    %c5 = arith.constant 5 : index
    %c0_7 = arith.constant 0 : index
    %28 = memref.load %arg1[%c5, %c0_7] : memref<8x6xf32, #tpu.memory_space<smem>>
    %29 = vector.broadcast %28 : f32 to vector<1x128xf32>
    %30 = arith.mulf %6, %29 : vector<1x128xf32>
    %31 = arith.addf %27, %30 : vector<1x128xf32>
    %c6 = arith.constant 6 : index
    %c0_8 = arith.constant 0 : index
    %32 = memref.load %arg1[%c6, %c0_8] : memref<8x6xf32, #tpu.memory_space<smem>>
    %33 = vector.broadcast %32 : f32 to vector<1x128xf32>
    %34 = arith.mulf %7, %33 : vector<1x128xf32>
    %35 = arith.addf %31, %34 : vector<1x128xf32>
    %c7 = arith.constant 7 : index
    %c0_9 = arith.constant 0 : index
    %36 = memref.load %arg1[%c7, %c0_9] : memref<8x6xf32, #tpu.memory_space<smem>>
    %37 = vector.broadcast %36 : f32 to vector<1x128xf32>
    %38 = arith.mulf %8, %37 : vector<1x128xf32>
    %39 = arith.addf %35, %38 : vector<1x128xf32>
    %c0_10 = arith.constant 0 : index
    %40 = memref.load %arg2[%c0_10] : memref<6xf32, #tpu.memory_space<smem>>
    %41 = vector.broadcast %40 : f32 to vector<1x128xf32>
    %42 = arith.addf %39, %41 : vector<1x128xf32>
    %43 = arith.negf %42 : vector<1x128xf32>
    %44 = math.exp %43 : vector<1x128xf32>
    %cst = arith.constant 1.000000e+00 : f32
    %45 = vector.broadcast %cst : f32 to vector<1x128xf32>
    %46 = arith.addf %45, %44 : vector<1x128xf32>
    %47 = arith.divf %45, %46 : vector<1x128xf32>
    %c0_11 = arith.constant 0 : index
    %c1_12 = arith.constant 1 : index
    %48 = memref.load %arg1[%c0_11, %c1_12] : memref<8x6xf32, #tpu.memory_space<smem>>
    %49 = vector.broadcast %48 : f32 to vector<1x128xf32>
    %50 = arith.mulf %1, %49 : vector<1x128xf32>
    %c1_13 = arith.constant 1 : index
    %c1_14 = arith.constant 1 : index
    %51 = memref.load %arg1[%c1_13, %c1_14] : memref<8x6xf32, #tpu.memory_space<smem>>
    %52 = vector.broadcast %51 : f32 to vector<1x128xf32>
    %53 = arith.mulf %2, %52 : vector<1x128xf32>
    %54 = arith.addf %50, %53 : vector<1x128xf32>
    %c2_15 = arith.constant 2 : index
    %c1_16 = arith.constant 1 : index
    %55 = memref.load %arg1[%c2_15, %c1_16] : memref<8x6xf32, #tpu.memory_space<smem>>
    %56 = vector.broadcast %55 : f32 to vector<1x128xf32>
    %57 = arith.mulf %3, %56 : vector<1x128xf32>
    %58 = arith.addf %54, %57 : vector<1x128xf32>
    %c3_17 = arith.constant 3 : index
    %c1_18 = arith.constant 1 : index
    %59 = memref.load %arg1[%c3_17, %c1_18] : memref<8x6xf32, #tpu.memory_space<smem>>
    %60 = vector.broadcast %59 : f32 to vector<1x128xf32>
    %61 = arith.mulf %4, %60 : vector<1x128xf32>
    %62 = arith.addf %58, %61 : vector<1x128xf32>
    %c4_19 = arith.constant 4 : index
    %c1_20 = arith.constant 1 : index
    %63 = memref.load %arg1[%c4_19, %c1_20] : memref<8x6xf32, #tpu.memory_space<smem>>
    %64 = vector.broadcast %63 : f32 to vector<1x128xf32>
    %65 = arith.mulf %5, %64 : vector<1x128xf32>
    %66 = arith.addf %62, %65 : vector<1x128xf32>
    %c5_21 = arith.constant 5 : index
    %c1_22 = arith.constant 1 : index
    %67 = memref.load %arg1[%c5_21, %c1_22] : memref<8x6xf32, #tpu.memory_space<smem>>
    %68 = vector.broadcast %67 : f32 to vector<1x128xf32>
    %69 = arith.mulf %6, %68 : vector<1x128xf32>
    %70 = arith.addf %66, %69 : vector<1x128xf32>
    %c6_23 = arith.constant 6 : index
    %c1_24 = arith.constant 1 : index
    %71 = memref.load %arg1[%c6_23, %c1_24] : memref<8x6xf32, #tpu.memory_space<smem>>
    %72 = vector.broadcast %71 : f32 to vector<1x128xf32>
    %73 = arith.mulf %7, %72 : vector<1x128xf32>
    %74 = arith.addf %70, %73 : vector<1x128xf32>
    %c7_25 = arith.constant 7 : index
    %c1_26 = arith.constant 1 : index
    %75 = memref.load %arg1[%c7_25, %c1_26] : memref<8x6xf32, #tpu.memory_space<smem>>
    %76 = vector.broadcast %75 : f32 to vector<1x128xf32>
    %77 = arith.mulf %8, %76 : vector<1x128xf32>
    %78 = arith.addf %74, %77 : vector<1x128xf32>
    %c1_27 = arith.constant 1 : index
    %79 = memref.load %arg2[%c1_27] : memref<6xf32, #tpu.memory_space<smem>>
    %80 = vector.broadcast %79 : f32 to vector<1x128xf32>
    %81 = arith.addf %78, %80 : vector<1x128xf32>
    %82 = arith.negf %81 : vector<1x128xf32>
    %83 = math.exp %82 : vector<1x128xf32>
    %cst_28 = arith.constant 1.000000e+00 : f32
    %84 = vector.broadcast %cst_28 : f32 to vector<1x128xf32>
    %85 = arith.addf %84, %83 : vector<1x128xf32>
    %86 = arith.divf %84, %85 : vector<1x128xf32>
    %c0_29 = arith.constant 0 : index
    %c2_30 = arith.constant 2 : index
    %87 = memref.load %arg1[%c0_29, %c2_30] : memref<8x6xf32, #tpu.memory_space<smem>>
    %88 = vector.broadcast %87 : f32 to vector<1x128xf32>
    %89 = arith.mulf %1, %88 : vector<1x128xf32>
    %c1_31 = arith.constant 1 : index
    %c2_32 = arith.constant 2 : index
    %90 = memref.load %arg1[%c1_31, %c2_32] : memref<8x6xf32, #tpu.memory_space<smem>>
    %91 = vector.broadcast %90 : f32 to vector<1x128xf32>
    %92 = arith.mulf %2, %91 : vector<1x128xf32>
    %93 = arith.addf %89, %92 : vector<1x128xf32>
    %c2_33 = arith.constant 2 : index
    %c2_34 = arith.constant 2 : index
    %94 = memref.load %arg1[%c2_33, %c2_34] : memref<8x6xf32, #tpu.memory_space<smem>>
    %95 = vector.broadcast %94 : f32 to vector<1x128xf32>
    %96 = arith.mulf %3, %95 : vector<1x128xf32>
    %97 = arith.addf %93, %96 : vector<1x128xf32>
    %c3_35 = arith.constant 3 : index
    %c2_36 = arith.constant 2 : index
    %98 = memref.load %arg1[%c3_35, %c2_36] : memref<8x6xf32, #tpu.memory_space<smem>>
    %99 = vector.broadcast %98 : f32 to vector<1x128xf32>
    %100 = arith.mulf %4, %99 : vector<1x128xf32>
    %101 = arith.addf %97, %100 : vector<1x128xf32>
    %c4_37 = arith.constant 4 : index
    %c2_38 = arith.constant 2 : index
    %102 = memref.load %arg1[%c4_37, %c2_38] : memref<8x6xf32, #tpu.memory_space<smem>>
    %103 = vector.broadcast %102 : f32 to vector<1x128xf32>
    %104 = arith.mulf %5, %103 : vector<1x128xf32>
    %105 = arith.addf %101, %104 : vector<1x128xf32>
    %c5_39 = arith.constant 5 : index
    %c2_40 = arith.constant 2 : index
    %106 = memref.load %arg1[%c5_39, %c2_40] : memref<8x6xf32, #tpu.memory_space<smem>>
    %107 = vector.broadcast %106 : f32 to vector<1x128xf32>
    %108 = arith.mulf %6, %107 : vector<1x128xf32>
    %109 = arith.addf %105, %108 : vector<1x128xf32>
    %c6_41 = arith.constant 6 : index
    %c2_42 = arith.constant 2 : index
    %110 = memref.load %arg1[%c6_41, %c2_42] : memref<8x6xf32, #tpu.memory_space<smem>>
    %111 = vector.broadcast %110 : f32 to vector<1x128xf32>
    %112 = arith.mulf %7, %111 : vector<1x128xf32>
    %113 = arith.addf %109, %112 : vector<1x128xf32>
    %c7_43 = arith.constant 7 : index
    %c2_44 = arith.constant 2 : index
    %114 = memref.load %arg1[%c7_43, %c2_44] : memref<8x6xf32, #tpu.memory_space<smem>>
    %115 = vector.broadcast %114 : f32 to vector<1x128xf32>
    %116 = arith.mulf %8, %115 : vector<1x128xf32>
    %117 = arith.addf %113, %116 : vector<1x128xf32>
    %c2_45 = arith.constant 2 : index
    %118 = memref.load %arg2[%c2_45] : memref<6xf32, #tpu.memory_space<smem>>
    %119 = vector.broadcast %118 : f32 to vector<1x128xf32>
    %120 = arith.addf %117, %119 : vector<1x128xf32>
    %121 = arith.negf %120 : vector<1x128xf32>
    %122 = math.exp %121 : vector<1x128xf32>
    %cst_46 = arith.constant 1.000000e+00 : f32
    %123 = vector.broadcast %cst_46 : f32 to vector<1x128xf32>
    %124 = arith.addf %123, %122 : vector<1x128xf32>
    %125 = arith.divf %123, %124 : vector<1x128xf32>
    %c0_47 = arith.constant 0 : index
    %c3_48 = arith.constant 3 : index
    %126 = memref.load %arg1[%c0_47, %c3_48] : memref<8x6xf32, #tpu.memory_space<smem>>
    %127 = vector.broadcast %126 : f32 to vector<1x128xf32>
    %128 = arith.mulf %1, %127 : vector<1x128xf32>
    %c1_49 = arith.constant 1 : index
    %c3_50 = arith.constant 3 : index
    %129 = memref.load %arg1[%c1_49, %c3_50] : memref<8x6xf32, #tpu.memory_space<smem>>
    %130 = vector.broadcast %129 : f32 to vector<1x128xf32>
    %131 = arith.mulf %2, %130 : vector<1x128xf32>
    %132 = arith.addf %128, %131 : vector<1x128xf32>
    %c2_51 = arith.constant 2 : index
    %c3_52 = arith.constant 3 : index
    %133 = memref.load %arg1[%c2_51, %c3_52] : memref<8x6xf32, #tpu.memory_space<smem>>
    %134 = vector.broadcast %133 : f32 to vector<1x128xf32>
    %135 = arith.mulf %3, %134 : vector<1x128xf32>
    %136 = arith.addf %132, %135 : vector<1x128xf32>
    %c3_53 = arith.constant 3 : index
    %c3_54 = arith.constant 3 : index
    %137 = memref.load %arg1[%c3_53, %c3_54] : memref<8x6xf32, #tpu.memory_space<smem>>
    %138 = vector.broadcast %137 : f32 to vector<1x128xf32>
    %139 = arith.mulf %4, %138 : vector<1x128xf32>
    %140 = arith.addf %136, %139 : vector<1x128xf32>
    %c4_55 = arith.constant 4 : index
    %c3_56 = arith.constant 3 : index
    %141 = memref.load %arg1[%c4_55, %c3_56] : memref<8x6xf32, #tpu.memory_space<smem>>
    %142 = vector.broadcast %141 : f32 to vector<1x128xf32>
    %143 = arith.mulf %5, %142 : vector<1x128xf32>
    %144 = arith.addf %140, %143 : vector<1x128xf32>
    %c5_57 = arith.constant 5 : index
    %c3_58 = arith.constant 3 : index
    %145 = memref.load %arg1[%c5_57, %c3_58] : memref<8x6xf32, #tpu.memory_space<smem>>
    %146 = vector.broadcast %145 : f32 to vector<1x128xf32>
    %147 = arith.mulf %6, %146 : vector<1x128xf32>
    %148 = arith.addf %144, %147 : vector<1x128xf32>
    %c6_59 = arith.constant 6 : index
    %c3_60 = arith.constant 3 : index
    %149 = memref.load %arg1[%c6_59, %c3_60] : memref<8x6xf32, #tpu.memory_space<smem>>
    %150 = vector.broadcast %149 : f32 to vector<1x128xf32>
    %151 = arith.mulf %7, %150 : vector<1x128xf32>
    %152 = arith.addf %148, %151 : vector<1x128xf32>
    %c7_61 = arith.constant 7 : index
    %c3_62 = arith.constant 3 : index
    %153 = memref.load %arg1[%c7_61, %c3_62] : memref<8x6xf32, #tpu.memory_space<smem>>
    %154 = vector.broadcast %153 : f32 to vector<1x128xf32>
    %155 = arith.mulf %8, %154 : vector<1x128xf32>
    %156 = arith.addf %152, %155 : vector<1x128xf32>
    %c3_63 = arith.constant 3 : index
    %157 = memref.load %arg2[%c3_63] : memref<6xf32, #tpu.memory_space<smem>>
    %158 = vector.broadcast %157 : f32 to vector<1x128xf32>
    %159 = arith.addf %156, %158 : vector<1x128xf32>
    %160 = arith.negf %159 : vector<1x128xf32>
    %161 = math.exp %160 : vector<1x128xf32>
    %cst_64 = arith.constant 1.000000e+00 : f32
    %162 = vector.broadcast %cst_64 : f32 to vector<1x128xf32>
    %163 = arith.addf %162, %161 : vector<1x128xf32>
    %164 = arith.divf %162, %163 : vector<1x128xf32>
    %c0_65 = arith.constant 0 : index
    %c4_66 = arith.constant 4 : index
    %165 = memref.load %arg1[%c0_65, %c4_66] : memref<8x6xf32, #tpu.memory_space<smem>>
    %166 = vector.broadcast %165 : f32 to vector<1x128xf32>
    %167 = arith.mulf %1, %166 : vector<1x128xf32>
    %c1_67 = arith.constant 1 : index
    %c4_68 = arith.constant 4 : index
    %168 = memref.load %arg1[%c1_67, %c4_68] : memref<8x6xf32, #tpu.memory_space<smem>>
    %169 = vector.broadcast %168 : f32 to vector<1x128xf32>
    %170 = arith.mulf %2, %169 : vector<1x128xf32>
    %171 = arith.addf %167, %170 : vector<1x128xf32>
    %c2_69 = arith.constant 2 : index
    %c4_70 = arith.constant 4 : index
    %172 = memref.load %arg1[%c2_69, %c4_70] : memref<8x6xf32, #tpu.memory_space<smem>>
    %173 = vector.broadcast %172 : f32 to vector<1x128xf32>
    %174 = arith.mulf %3, %173 : vector<1x128xf32>
    %175 = arith.addf %171, %174 : vector<1x128xf32>
    %c3_71 = arith.constant 3 : index
    %c4_72 = arith.constant 4 : index
    %176 = memref.load %arg1[%c3_71, %c4_72] : memref<8x6xf32, #tpu.memory_space<smem>>
    %177 = vector.broadcast %176 : f32 to vector<1x128xf32>
    %178 = arith.mulf %4, %177 : vector<1x128xf32>
    %179 = arith.addf %175, %178 : vector<1x128xf32>
    %c4_73 = arith.constant 4 : index
    %c4_74 = arith.constant 4 : index
    %180 = memref.load %arg1[%c4_73, %c4_74] : memref<8x6xf32, #tpu.memory_space<smem>>
    %181 = vector.broadcast %180 : f32 to vector<1x128xf32>
    %182 = arith.mulf %5, %181 : vector<1x128xf32>
    %183 = arith.addf %179, %182 : vector<1x128xf32>
    %c5_75 = arith.constant 5 : index
    %c4_76 = arith.constant 4 : index
    %184 = memref.load %arg1[%c5_75, %c4_76] : memref<8x6xf32, #tpu.memory_space<smem>>
    %185 = vector.broadcast %184 : f32 to vector<1x128xf32>
    %186 = arith.mulf %6, %185 : vector<1x128xf32>
    %187 = arith.addf %183, %186 : vector<1x128xf32>
    %c6_77 = arith.constant 6 : index
    %c4_78 = arith.constant 4 : index
    %188 = memref.load %arg1[%c6_77, %c4_78] : memref<8x6xf32, #tpu.memory_space<smem>>
    %189 = vector.broadcast %188 : f32 to vector<1x128xf32>
    %190 = arith.mulf %7, %189 : vector<1x128xf32>
    %191 = arith.addf %187, %190 : vector<1x128xf32>
    %c7_79 = arith.constant 7 : index
    %c4_80 = arith.constant 4 : index
    %192 = memref.load %arg1[%c7_79, %c4_80] : memref<8x6xf32, #tpu.memory_space<smem>>
    %193 = vector.broadcast %192 : f32 to vector<1x128xf32>
    %194 = arith.mulf %8, %193 : vector<1x128xf32>
    %195 = arith.addf %191, %194 : vector<1x128xf32>
    %c4_81 = arith.constant 4 : index
    %196 = memref.load %arg2[%c4_81] : memref<6xf32, #tpu.memory_space<smem>>
    %197 = vector.broadcast %196 : f32 to vector<1x128xf32>
    %198 = arith.addf %195, %197 : vector<1x128xf32>
    %199 = arith.negf %198 : vector<1x128xf32>
    %200 = math.exp %199 : vector<1x128xf32>
    %cst_82 = arith.constant 1.000000e+00 : f32
    %201 = vector.broadcast %cst_82 : f32 to vector<1x128xf32>
    %202 = arith.addf %201, %200 : vector<1x128xf32>
    %203 = arith.divf %201, %202 : vector<1x128xf32>
    %c0_83 = arith.constant 0 : index
    %c5_84 = arith.constant 5 : index
    %204 = memref.load %arg1[%c0_83, %c5_84] : memref<8x6xf32, #tpu.memory_space<smem>>
    %205 = vector.broadcast %204 : f32 to vector<1x128xf32>
    %206 = arith.mulf %1, %205 : vector<1x128xf32>
    %c1_85 = arith.constant 1 : index
    %c5_86 = arith.constant 5 : index
    %207 = memref.load %arg1[%c1_85, %c5_86] : memref<8x6xf32, #tpu.memory_space<smem>>
    %208 = vector.broadcast %207 : f32 to vector<1x128xf32>
    %209 = arith.mulf %2, %208 : vector<1x128xf32>
    %210 = arith.addf %206, %209 : vector<1x128xf32>
    %c2_87 = arith.constant 2 : index
    %c5_88 = arith.constant 5 : index
    %211 = memref.load %arg1[%c2_87, %c5_88] : memref<8x6xf32, #tpu.memory_space<smem>>
    %212 = vector.broadcast %211 : f32 to vector<1x128xf32>
    %213 = arith.mulf %3, %212 : vector<1x128xf32>
    %214 = arith.addf %210, %213 : vector<1x128xf32>
    %c3_89 = arith.constant 3 : index
    %c5_90 = arith.constant 5 : index
    %215 = memref.load %arg1[%c3_89, %c5_90] : memref<8x6xf32, #tpu.memory_space<smem>>
    %216 = vector.broadcast %215 : f32 to vector<1x128xf32>
    %217 = arith.mulf %4, %216 : vector<1x128xf32>
    %218 = arith.addf %214, %217 : vector<1x128xf32>
    %c4_91 = arith.constant 4 : index
    %c5_92 = arith.constant 5 : index
    %219 = memref.load %arg1[%c4_91, %c5_92] : memref<8x6xf32, #tpu.memory_space<smem>>
    %220 = vector.broadcast %219 : f32 to vector<1x128xf32>
    %221 = arith.mulf %5, %220 : vector<1x128xf32>
    %222 = arith.addf %218, %221 : vector<1x128xf32>
    %c5_93 = arith.constant 5 : index
    %c5_94 = arith.constant 5 : index
    %223 = memref.load %arg1[%c5_93, %c5_94] : memref<8x6xf32, #tpu.memory_space<smem>>
    %224 = vector.broadcast %223 : f32 to vector<1x128xf32>
    %225 = arith.mulf %6, %224 : vector<1x128xf32>
    %226 = arith.addf %222, %225 : vector<1x128xf32>
    %c6_95 = arith.constant 6 : index
    %c5_96 = arith.constant 5 : index
    %227 = memref.load %arg1[%c6_95, %c5_96] : memref<8x6xf32, #tpu.memory_space<smem>>
    %228 = vector.broadcast %227 : f32 to vector<1x128xf32>
    %229 = arith.mulf %7, %228 : vector<1x128xf32>
    %230 = arith.addf %226, %229 : vector<1x128xf32>
    %c7_97 = arith.constant 7 : index
    %c5_98 = arith.constant 5 : index
    %231 = memref.load %arg1[%c7_97, %c5_98] : memref<8x6xf32, #tpu.memory_space<smem>>
    %232 = vector.broadcast %231 : f32 to vector<1x128xf32>
    %233 = arith.mulf %8, %232 : vector<1x128xf32>
    %234 = arith.addf %230, %233 : vector<1x128xf32>
    %c5_99 = arith.constant 5 : index
    %235 = memref.load %arg2[%c5_99] : memref<6xf32, #tpu.memory_space<smem>>
    %236 = vector.broadcast %235 : f32 to vector<1x128xf32>
    %237 = arith.addf %234, %236 : vector<1x128xf32>
    %238 = arith.negf %237 : vector<1x128xf32>
    %239 = math.exp %238 : vector<1x128xf32>
    %cst_100 = arith.constant 1.000000e+00 : f32
    %240 = vector.broadcast %cst_100 : f32 to vector<1x128xf32>
    %241 = arith.addf %240, %239 : vector<1x128xf32>
    %242 = arith.divf %240, %241 : vector<1x128xf32>
    %c0_101 = arith.constant 0 : index
    %c0_102 = arith.constant 0 : index
    %243 = memref.load %arg3[%c0_101, %c0_102] : memref<6x4xf32, #tpu.memory_space<smem>>
    %244 = vector.broadcast %243 : f32 to vector<1x128xf32>
    %245 = arith.mulf %47, %244 : vector<1x128xf32>
    %c1_103 = arith.constant 1 : index
    %c0_104 = arith.constant 0 : index
    %246 = memref.load %arg3[%c1_103, %c0_104] : memref<6x4xf32, #tpu.memory_space<smem>>
    %247 = vector.broadcast %246 : f32 to vector<1x128xf32>
    %248 = arith.mulf %86, %247 : vector<1x128xf32>
    %249 = arith.addf %245, %248 : vector<1x128xf32>
    %c2_105 = arith.constant 2 : index
    %c0_106 = arith.constant 0 : index
    %250 = memref.load %arg3[%c2_105, %c0_106] : memref<6x4xf32, #tpu.memory_space<smem>>
    %251 = vector.broadcast %250 : f32 to vector<1x128xf32>
    %252 = arith.mulf %125, %251 : vector<1x128xf32>
    %253 = arith.addf %249, %252 : vector<1x128xf32>
    %c3_107 = arith.constant 3 : index
    %c0_108 = arith.constant 0 : index
    %254 = memref.load %arg3[%c3_107, %c0_108] : memref<6x4xf32, #tpu.memory_space<smem>>
    %255 = vector.broadcast %254 : f32 to vector<1x128xf32>
    %256 = arith.mulf %164, %255 : vector<1x128xf32>
    %257 = arith.addf %253, %256 : vector<1x128xf32>
    %c4_109 = arith.constant 4 : index
    %c0_110 = arith.constant 0 : index
    %258 = memref.load %arg3[%c4_109, %c0_110] : memref<6x4xf32, #tpu.memory_space<smem>>
    %259 = vector.broadcast %258 : f32 to vector<1x128xf32>
    %260 = arith.mulf %203, %259 : vector<1x128xf32>
    %261 = arith.addf %257, %260 : vector<1x128xf32>
    %c5_111 = arith.constant 5 : index
    %c0_112 = arith.constant 0 : index
    %262 = memref.load %arg3[%c5_111, %c0_112] : memref<6x4xf32, #tpu.memory_space<smem>>
    %263 = vector.broadcast %262 : f32 to vector<1x128xf32>
    %264 = arith.mulf %242, %263 : vector<1x128xf32>
    %265 = arith.addf %261, %264 : vector<1x128xf32>
    %c0_113 = arith.constant 0 : index
    %266 = memref.load %arg4[%c0_113] : memref<4xf32, #tpu.memory_space<smem>>
    %267 = vector.broadcast %266 : f32 to vector<1x128xf32>
    %268 = arith.addf %265, %267 : vector<1x128xf32>
    %269 = arith.negf %268 : vector<1x128xf32>
    %270 = math.exp %269 : vector<1x128xf32>
    %cst_114 = arith.constant 1.000000e+00 : f32
    %271 = vector.broadcast %cst_114 : f32 to vector<1x128xf32>
    %272 = arith.addf %271, %270 : vector<1x128xf32>
    %273 = arith.divf %271, %272 : vector<1x128xf32>
    %c0_115 = arith.constant 0 : index
    %c1_116 = arith.constant 1 : index
    %274 = memref.load %arg3[%c0_115, %c1_116] : memref<6x4xf32, #tpu.memory_space<smem>>
    %275 = vector.broadcast %274 : f32 to vector<1x128xf32>
    %276 = arith.mulf %47, %275 : vector<1x128xf32>
    %c1_117 = arith.constant 1 : index
    %c1_118 = arith.constant 1 : index
    %277 = memref.load %arg3[%c1_117, %c1_118] : memref<6x4xf32, #tpu.memory_space<smem>>
    %278 = vector.broadcast %277 : f32 to vector<1x128xf32>
    %279 = arith.mulf %86, %278 : vector<1x128xf32>
    %280 = arith.addf %276, %279 : vector<1x128xf32>
    %c2_119 = arith.constant 2 : index
    %c1_120 = arith.constant 1 : index
    %281 = memref.load %arg3[%c2_119, %c1_120] : memref<6x4xf32, #tpu.memory_space<smem>>
    %282 = vector.broadcast %281 : f32 to vector<1x128xf32>
    %283 = arith.mulf %125, %282 : vector<1x128xf32>
    %284 = arith.addf %280, %283 : vector<1x128xf32>
    %c3_121 = arith.constant 3 : index
    %c1_122 = arith.constant 1 : index
    %285 = memref.load %arg3[%c3_121, %c1_122] : memref<6x4xf32, #tpu.memory_space<smem>>
    %286 = vector.broadcast %285 : f32 to vector<1x128xf32>
    %287 = arith.mulf %164, %286 : vector<1x128xf32>
    %288 = arith.addf %284, %287 : vector<1x128xf32>
    %c4_123 = arith.constant 4 : index
    %c1_124 = arith.constant 1 : index
    %289 = memref.load %arg3[%c4_123, %c1_124] : memref<6x4xf32, #tpu.memory_space<smem>>
    %290 = vector.broadcast %289 : f32 to vector<1x128xf32>
    %291 = arith.mulf %203, %290 : vector<1x128xf32>
    %292 = arith.addf %288, %291 : vector<1x128xf32>
    %c5_125 = arith.constant 5 : index
    %c1_126 = arith.constant 1 : index
    %293 = memref.load %arg3[%c5_125, %c1_126] : memref<6x4xf32, #tpu.memory_space<smem>>
    %294 = vector.broadcast %293 : f32 to vector<1x128xf32>
    %295 = arith.mulf %242, %294 : vector<1x128xf32>
    %296 = arith.addf %292, %295 : vector<1x128xf32>
    %c1_127 = arith.constant 1 : index
    %297 = memref.load %arg4[%c1_127] : memref<4xf32, #tpu.memory_space<smem>>
    %298 = vector.broadcast %297 : f32 to vector<1x128xf32>
    %299 = arith.addf %296, %298 : vector<1x128xf32>
    %300 = arith.negf %299 : vector<1x128xf32>
    %301 = math.exp %300 : vector<1x128xf32>
    %cst_128 = arith.constant 1.000000e+00 : f32
    %302 = vector.broadcast %cst_128 : f32 to vector<1x128xf32>
    %303 = arith.addf %302, %301 : vector<1x128xf32>
    %304 = arith.divf %302, %303 : vector<1x128xf32>
    %c0_129 = arith.constant 0 : index
    %c2_130 = arith.constant 2 : index
    %305 = memref.load %arg3[%c0_129, %c2_130] : memref<6x4xf32, #tpu.memory_space<smem>>
    %306 = vector.broadcast %305 : f32 to vector<1x128xf32>
    %307 = arith.mulf %47, %306 : vector<1x128xf32>
    %c1_131 = arith.constant 1 : index
    %c2_132 = arith.constant 2 : index
    %308 = memref.load %arg3[%c1_131, %c2_132] : memref<6x4xf32, #tpu.memory_space<smem>>
    %309 = vector.broadcast %308 : f32 to vector<1x128xf32>
    %310 = arith.mulf %86, %309 : vector<1x128xf32>
    %311 = arith.addf %307, %310 : vector<1x128xf32>
    %c2_133 = arith.constant 2 : index
    %c2_134 = arith.constant 2 : index
    %312 = memref.load %arg3[%c2_133, %c2_134] : memref<6x4xf32, #tpu.memory_space<smem>>
    %313 = vector.broadcast %312 : f32 to vector<1x128xf32>
    %314 = arith.mulf %125, %313 : vector<1x128xf32>
    %315 = arith.addf %311, %314 : vector<1x128xf32>
    %c3_135 = arith.constant 3 : index
    %c2_136 = arith.constant 2 : index
    %316 = memref.load %arg3[%c3_135, %c2_136] : memref<6x4xf32, #tpu.memory_space<smem>>
    %317 = vector.broadcast %316 : f32 to vector<1x128xf32>
    %318 = arith.mulf %164, %317 : vector<1x128xf32>
    %319 = arith.addf %315, %318 : vector<1x128xf32>
    %c4_137 = arith.constant 4 : index
    %c2_138 = arith.constant 2 : index
    %320 = memref.load %arg3[%c4_137, %c2_138] : memref<6x4xf32, #tpu.memory_space<smem>>
    %321 = vector.broadcast %320 : f32 to vector<1x128xf32>
    %322 = arith.mulf %203, %321 : vector<1x128xf32>
    %323 = arith.addf %319, %322 : vector<1x128xf32>
    %c5_139 = arith.constant 5 : index
    %c2_140 = arith.constant 2 : index
    %324 = memref.load %arg3[%c5_139, %c2_140] : memref<6x4xf32, #tpu.memory_space<smem>>
    %325 = vector.broadcast %324 : f32 to vector<1x128xf32>
    %326 = arith.mulf %242, %325 : vector<1x128xf32>
    %327 = arith.addf %323, %326 : vector<1x128xf32>
    %c2_141 = arith.constant 2 : index
    %328 = memref.load %arg4[%c2_141] : memref<4xf32, #tpu.memory_space<smem>>
    %329 = vector.broadcast %328 : f32 to vector<1x128xf32>
    %330 = arith.addf %327, %329 : vector<1x128xf32>
    %331 = arith.negf %330 : vector<1x128xf32>
    %332 = math.exp %331 : vector<1x128xf32>
    %cst_142 = arith.constant 1.000000e+00 : f32
    %333 = vector.broadcast %cst_142 : f32 to vector<1x128xf32>
    %334 = arith.addf %333, %332 : vector<1x128xf32>
    %335 = arith.divf %333, %334 : vector<1x128xf32>
    %c0_143 = arith.constant 0 : index
    %c3_144 = arith.constant 3 : index
    %336 = memref.load %arg3[%c0_143, %c3_144] : memref<6x4xf32, #tpu.memory_space<smem>>
    %337 = vector.broadcast %336 : f32 to vector<1x128xf32>
    %338 = arith.mulf %47, %337 : vector<1x128xf32>
    %c1_145 = arith.constant 1 : index
    %c3_146 = arith.constant 3 : index
    %339 = memref.load %arg3[%c1_145, %c3_146] : memref<6x4xf32, #tpu.memory_space<smem>>
    %340 = vector.broadcast %339 : f32 to vector<1x128xf32>
    %341 = arith.mulf %86, %340 : vector<1x128xf32>
    %342 = arith.addf %338, %341 : vector<1x128xf32>
    %c2_147 = arith.constant 2 : index
    %c3_148 = arith.constant 3 : index
    %343 = memref.load %arg3[%c2_147, %c3_148] : memref<6x4xf32, #tpu.memory_space<smem>>
    %344 = vector.broadcast %343 : f32 to vector<1x128xf32>
    %345 = arith.mulf %125, %344 : vector<1x128xf32>
    %346 = arith.addf %342, %345 : vector<1x128xf32>
    %c3_149 = arith.constant 3 : index
    %c3_150 = arith.constant 3 : index
    %347 = memref.load %arg3[%c3_149, %c3_150] : memref<6x4xf32, #tpu.memory_space<smem>>
    %348 = vector.broadcast %347 : f32 to vector<1x128xf32>
    %349 = arith.mulf %164, %348 : vector<1x128xf32>
    %350 = arith.addf %346, %349 : vector<1x128xf32>
    %c4_151 = arith.constant 4 : index
    %c3_152 = arith.constant 3 : index
    %351 = memref.load %arg3[%c4_151, %c3_152] : memref<6x4xf32, #tpu.memory_space<smem>>
    %352 = vector.broadcast %351 : f32 to vector<1x128xf32>
    %353 = arith.mulf %203, %352 : vector<1x128xf32>
    %354 = arith.addf %350, %353 : vector<1x128xf32>
    %c5_153 = arith.constant 5 : index
    %c3_154 = arith.constant 3 : index
    %355 = memref.load %arg3[%c5_153, %c3_154] : memref<6x4xf32, #tpu.memory_space<smem>>
    %356 = vector.broadcast %355 : f32 to vector<1x128xf32>
    %357 = arith.mulf %242, %356 : vector<1x128xf32>
    %358 = arith.addf %354, %357 : vector<1x128xf32>
    %c3_155 = arith.constant 3 : index
    %359 = memref.load %arg4[%c3_155] : memref<4xf32, #tpu.memory_space<smem>>
    %360 = vector.broadcast %359 : f32 to vector<1x128xf32>
    %361 = arith.addf %358, %360 : vector<1x128xf32>
    %362 = arith.negf %361 : vector<1x128xf32>
    %363 = math.exp %362 : vector<1x128xf32>
    %cst_156 = arith.constant 1.000000e+00 : f32
    %364 = vector.broadcast %cst_156 : f32 to vector<1x128xf32>
    %365 = arith.addf %364, %363 : vector<1x128xf32>
    %366 = arith.divf %364, %365 : vector<1x128xf32>
    %c0_157 = arith.constant 0 : index
    %c0_158 = arith.constant 0 : index
    %367 = memref.load %arg5[%c0_157, %c0_158] : memref<4x1xf32, #tpu.memory_space<smem>>
    %368 = vector.broadcast %367 : f32 to vector<1x128xf32>
    %369 = arith.mulf %273, %368 : vector<1x128xf32>
    %c1_159 = arith.constant 1 : index
    %c0_160 = arith.constant 0 : index
    %370 = memref.load %arg5[%c1_159, %c0_160] : memref<4x1xf32, #tpu.memory_space<smem>>
    %371 = vector.broadcast %370 : f32 to vector<1x128xf32>
    %372 = arith.mulf %304, %371 : vector<1x128xf32>
    %373 = arith.addf %369, %372 : vector<1x128xf32>
    %c2_161 = arith.constant 2 : index
    %c0_162 = arith.constant 0 : index
    %374 = memref.load %arg5[%c2_161, %c0_162] : memref<4x1xf32, #tpu.memory_space<smem>>
    %375 = vector.broadcast %374 : f32 to vector<1x128xf32>
    %376 = arith.mulf %335, %375 : vector<1x128xf32>
    %377 = arith.addf %373, %376 : vector<1x128xf32>
    %c3_163 = arith.constant 3 : index
    %c0_164 = arith.constant 0 : index
    %378 = memref.load %arg5[%c3_163, %c0_164] : memref<4x1xf32, #tpu.memory_space<smem>>
    %379 = vector.broadcast %378 : f32 to vector<1x128xf32>
    %380 = arith.mulf %366, %379 : vector<1x128xf32>
    %381 = arith.addf %377, %380 : vector<1x128xf32>
    %c0_165 = arith.constant 0 : index
    %382 = memref.load %arg6[%c0_165] : memref<1xf32, #tpu.memory_space<smem>>
    %383 = vector.broadcast %382 : f32 to vector<1x128xf32>
    %384 = arith.addf %381, %383 : vector<1x128xf32>
    %385 = arith.negf %384 : vector<1x128xf32>
    %386 = math.exp %385 : vector<1x128xf32>
    %cst_166 = arith.constant 1.000000e+00 : f32
    %387 = vector.broadcast %cst_166 : f32 to vector<1x128xf32>
    %388 = arith.addf %387, %386 : vector<1x128xf32>
    %389 = arith.divf %387, %388 : vector<1x128xf32>
    %c0_167 = arith.constant 0 : index
    %c0_168 = arith.constant 0 : index
    %390 = vector.load %arg8[%c0_167, %c0_168] : memref<1x128xf32, #tpu.memory_space<vmem>>, vector<1x128xf32>
    tpu.vector_store %arg8[%c0_167, %c0_168], %389 {strides = array<i32>} : memref<1x128xf32, #tpu.memory_space<vmem>>, vector<1x128xf32>,
    return
  }
  func.func @transform_0(%arg0: i32) -> (i32, i32) {
    %c0_i32 = arith.constant 0 : i32
    %c0_i32_0 = arith.constant 0 : i32
    %c0_i32_1 = arith.constant 0 : i32
    return %c0_i32, %c0_i32_0 : i32, i32
  }
  func.func @transform_1(%arg0: i32) -> i32 {
    %c0_i32 = arith.constant 0 : i32
    %c0_i32_0 = arith.constant 0 : i32
    return %c0_i32 : i32
  }
  func.func @transform_2(%arg0: i32) -> (i32, i32) {
    %c0_i32 = arith.constant 0 : i32
    %c0_i32_0 = arith.constant 0 : i32
    %c0_i32_1 = arith.constant 0 : i32
    return %c0_i32, %c0_i32_0 : i32, i32
  }
  func.func @transform_3(%arg0: i32) -> i32 {
    %c0_i32 = arith.constant 0 : i32
    %c0_i32_0 = arith.constant 0 : i32
    return %c0_i32 : i32
  }
  func.func @transform_4(%arg0: i32) -> (i32, i32) {
    %c0_i32 = arith.constant 0 : i32
    %c0_i32_0 = arith.constant 0 : i32
    %c0_i32_1 = arith.constant 0 : i32
    return %c0_i32, %c0_i32_0 : i32, i32
  }
  func.func @transform_5(%arg0: i32) -> i32 {
    %c0_i32 = arith.constant 0 : i32
    %c0_i32_0 = arith.constant 0 : i32
    return %c0_i32 : i32
  }
  func.func @transform_6(%arg0: i32) -> (i32, i32) {
    %c0_i32 = arith.constant 0 : i32
    %c0_i32_0 = arith.constant 0 : i32
    return %c0_i32, %arg0 : i32, i32
  }
  func.func @transform_7(%arg0: i32) -> (i32, i32) {
    %c0_i32 = arith.constant 0 : i32
    %c0_i32_0 = arith.constant 0 : i32
    return %c0_i32, %arg0 : i32, i32
  }
}

</mosaic_0001>

<bundles_post_ra>
// kernel: tpu_custom_call.1
= control target key start
LH: loop header
LB: loop body
LE: loop exit
PB: predicated region body
PF: predicated region fallthrough
CT: control target
= control target key end

     0   :  { %13 = vsyncpa [#allocation5], 0  ;;  %s1198_s0 = inlined_call_operand.vmem [shape: f32[8,6], index: 0, kind: input, shape index: {}]   ;;  %s1199_s1 = inlined_call_operand.vmem [shape: f32[6], index: 1, kind: input, shape index: {}]   ;;  %s1200_s2 = inlined_call_operand.vmem [shape: f32[6,4], index: 2, kind: input, shape index: {}]   ;;  %s1201_s3 = inlined_call_operand.vmem [shape: f32[4], index: 3, kind: input, shape index: {}]   ;;  %s1202_s4 = inlined_call_operand.vmem [shape: f32[4,1], index: 4, kind: input, shape index: {}]   ;;  %s1203_s5 = inlined_call_operand.<no memory space> [shape: f32[1], index: 5, kind: input, shape index: {}]   ;;  %s1204_s6 = inlined_call_operand.vmem [shape: f32[8,128], index: 6, kind: input, shape index: {}]   ;;  %s1205_s7 = inlined_call_operand.hbm [shape: f32[1,128], index: 7, kind: output, shape index: {}]  }
   0x1   :  { %14 = vsyncpa [#allocation7], 0 }
   0x2   :  { %15 = vsyncpa [#allocation10], 0  ;;  %s33_s26 = sshll.u32 %s1199_s1, 4  ;;  %s34_s26 = int_to_ptr.vmem [resolvable:$true] %s33_s26 }
   0x3   :  { %16 = vsyncpa [#allocation4], 0  ;;  %s53_s29 = sshll.u32 %s1201_s3, 4  ;;  %s766_s30 = scalar_lea.vmem %s34_s26, 16  ;;  %s54_s29 = int_to_ptr.vmem [resolvable:$true] %s53_s29 }
   0x4   :  { %p767_p0 = scmp.ne.s32.totalorder %s34_s26, %s766_s30  ;;  %p771_p1 = scmp.lt.s32.totalorder %s34_s26, %s34_s26 }
   0x5   :  { %p772_p2 = scmp.lt.s32.totalorder %s766_s30, %s766_s30 }
   0x7   :  { %p773_p3 = por %p772_p2, %p771_p1 }
   0x9   :  { %p774_p4 = pnand %p773_p3, %p767_p0 }
   0xb   :  { %777 = shalt.err (!%p774_p4)
}
   0xc   :  { %s856_s8 = smov [#allocation6]   ;;  %s778_s9 = scalar_lea.vmem %s54_s29, 16 }
   0xd   :  { %36 = dma.vmem_to_smem %s34_s26, 16, %s856_s8, [#allocation7]  }
   0xe   :  { %p779_p5 = scmp.ne.s32.totalorder %s54_s29, %s778_s9  ;;  %p783_p6 = scmp.lt.s32.totalorder %s54_s29, %s54_s29 }
   0xf   :  { %p784_p7 = scmp.lt.s32.totalorder %s778_s9, %s778_s9 }
  0x11   :  { %p785_p8 = por %p784_p7, %p783_p6 }
  0x13   :  { %p786_p9 = pnand %p785_p8, %p779_p5 }
  0x15   :  { %789 = shalt.err (!%p786_p9)
}
  0x16   :  { %s857_s1 = smov [#allocation9]   ;;  %s23_s11 = sshll.u32 %s1198_s0, 4  ;;  %s24_s11 = int_to_ptr.vmem [resolvable:$true] %s23_s11 }
  0x17   :  { %56 = dma.vmem_to_smem %s54_s29, 16, %s857_s1, [#allocation10]  }
  0x18   :  { %s43_s14 = sshll.u32 %s1200_s2, 4  ;;  %s790_s15 = scalar_lea.vmem %s24_s11, 128  ;;  %s44_s14 = int_to_ptr.vmem [resolvable:$true] %s43_s14 }
  0x19   :  { %p791_p10 = scmp.ne.s32.totalorder %s24_s11, %s790_s15  ;;  %p795_p11 = scmp.lt.s32.totalorder %s24_s11, %s24_s11 }
  0x1a   :  { %p796_p12 = scmp.lt.s32.totalorder %s790_s15, %s790_s15 }
  0x1c   :  { %p797_p13 = por %p796_p12, %p795_p11 }
  0x1e   :  { %p798_p0 = pnand %p797_p13, %p791_p10 }
  0x20   :  { %801 = shalt.err (!%p798_p0)
}
  0x21   :  { %s858_s16 = smov [#allocation3]   ;;  %s802_s17 = scalar_lea.vmem %s44_s14, 128 }
  0x22   :  { %26 = dma.vmem_to_smem %s24_s11, 128, %s858_s16, [#allocation5]  }
  0x23   :  { %p803_p1 = scmp.ne.s32.totalorder %s44_s14, %s802_s17  ;;  %p807_p2 = scmp.lt.s32.totalorder %s44_s14, %s44_s14 }
  0x24   :  { %p808_p3 = scmp.lt.s32.totalorder %s802_s17, %s802_s17 }
  0x26   :  { %p809_p4 = por %p808_p3, %p807_p2 }
  0x28   :  { %p810_p5 = pnand %p809_p4, %p803_p1 }
  0x2a   :  { %813 = shalt.err (!%p810_p5)
}
  0x2b   :  { %s859_s0 = smov [#allocation8]   ;;  %s63_s19 = sshll.u32 %s1202_s4, 4  ;;  %s64_s19 = int_to_ptr.vmem [resolvable:$true] %s63_s19 }
  0x2c   :  { %46 = dma.vmem_to_smem %s44_s14, 128, %s859_s0, [#allocation7]  }
  0x2d   :  { %s814_s20 = scalar_lea.vmem %s64_s19, 64  ;;  %p819_p7 = scmp.lt.s32.totalorder %s64_s19, %s64_s19 }
  0x2e   :  { %p815_p6 = scmp.ne.s32.totalorder %s64_s19, %s814_s20  ;;  %p820_p8 = scmp.lt.s32.totalorder %s814_s20, %s814_s20 }
  0x30   :  { %p821_p9 = por %p820_p8, %p819_p7 }
  0x32   :  { %p822_p10 = pnand %p821_p9, %p815_p6 }
  0x34   :  { %825 = shalt.err (!%p822_p10)
}
  0x35   :  { %s860_s21 = smov [#allocation11]  }
  0x36   :  { %66 = dma.vmem_to_smem %s64_s19, 64, %s860_s21, [#allocation10]  }
  0x37   :  { %848 = dma.done.wait [#allocation5], 128  }
  0x38   :  { %849 = vsyncadd [#allocation5], 4294967168 }
  0x39   :  { %850 = dma.done.wait [#allocation7], 144  }
  0x3a   :  { %851 = vsyncadd [#allocation7], 4294967152 }
  0x3b   :  { %852 = dma.done.wait [#allocation10], 80  }
  0x3c   :  { %853 = vsyncadd [#allocation10], 4294967216 }
  0x3d   :  { %86 = sfence }
  0x3e   :  { %s88_s22 = sld [smem:[#allocation3]]  ;;  %v922_v0 = vld [vmem:[%s1204_s6] sm:$0xff]  ;;  %s924_s8 = sld [smem:[#allocation3 + $0x1]] }
  0x3f   :  { %s624_s23 = sld [smem:[#allocation3 + $0x80]]  ;;  %s926_s9 = sld [smem:[#allocation3 + $0x81]] }
  0x40   :  { %s625_s4 = sld [smem:[#allocation3 + $0x100]]  ;;  %s928_s1 = sld [smem:[#allocation3 + $0x101]] }
  0x41   :  { %s626_s24 = sld [smem:[#allocation3 + $0x180]]  ;;  %s930_s3 = sld [smem:[#allocation3 + $0x181]] }
  0x42   :  { %s627_s25 = sld [smem:[#allocation3 + $0x200]]  ;;  %s932_s10 = sld [smem:[#allocation3 + $0x201]] }
  0x43   :  { %s628_s26 = sld [smem:[#allocation3 + $0x280]]  ;;  %s936_s6 = sld [smem:[#allocation3 + $0x281]] }
  0x44   :  { %s629_s27 = sld [smem:[#allocation3 + $0x300]]  ;;  %v89_v1 = vstv %s88_s22  ;;  %s940_s11 = sld [smem:[#allocation3 + $0x301]]  ;;  %v150_v23 = vstv %s924_s8 }
  0x45   :  { %s917_s28 = sld [smem:[#allocation3 + $0x380]]  ;;  %v92_v2 = vstv %s624_s23  ;;  %v90_v3 = vmul.f32 %v89_v1, %v922_v0  ;;  %s942_s12 = sld [smem:[#allocation3 + $0x381]]  ;;  %v153_v24 = vstv %s926_s9  ;;  %v151_v27 = vmul.f32 %v150_v23, %v922_v0 }
  0x46   :  { %v93_v4 = vmul.f32 %v92_v2, %v922_v0  ;;  %v99_v5 = vstv %s625_s4  ;;  %s948_s13 = sld [smem:[#allocation6]]  ;;  %s950_s14 = sld [smem:[#allocation3 + $0x2]]  ;;  %v154_v28 = vmul.f32 %v153_v24, %v922_v0  ;;  %v160_v29 = vstv %s928_s1 }
  0x47   :  { %v106_v6 = vstv %s626_s24  ;;  %v100_v7 = vmul.f32 %v99_v5, %v922_v0  ;;  %s955_s15 = sld [smem:[#allocation3 + $0x82]]  ;;  %v167_v30 = vstv %s930_s3  ;;  %v161_v35 = vmul.f32 %v160_v29, %v922_v0  ;;  %s983_s20 = sld [smem:[#allocation6 + $0x1]] }
  0x48   :  { %v107_v8 = vmul.f32 %v106_v6, %v922_v0  ;;  %v113_v9 = vstv %s627_s25  ;;  %v95_v11 = vrot.slane %v93_v4, 1  ;;  %s959_s16 = sld [smem:[#allocation3 + $0x102]]  ;;  %v174_v31 = vstv %s932_s10  ;;  %s989_s21 = sld [smem:[#allocation3 + $0x3]] }
  0x49   :  { %v120_v10 = vstv %s628_s26  ;;  %v114_v12 = vmul.f32 %v113_v9, %v922_v0  ;;  %v102_v15 = vrot.slane %v100_v7, 2  ;;  %s961_s17 = sld [smem:[#allocation3 + $0x182]]  ;;  %v181_v32 = vstv %s936_s6  ;;  %s991_s22 = sld [smem:[#allocation3 + $0x83]] }
  0x4a   :  { %v121_v13 = vmul.f32 %v120_v10, %v922_v0  ;;  %v127_v14 = vstv %s629_s27  ;;  %v97_v18 = vadd.f32 %v95_v11, %v90_v3  ;;  %v109_v19 = vrot.slane %v107_v8, 3  ;;  %s967_s0 = sld [smem:[#allocation3 + $0x202]]  ;;  %s999_s23 = sld [smem:[#allocation3 + $0x103]] }
  0x4b   :  { %v128_v16 = vmul.f32 %v127_v14, %v922_v0  ;;  %v134_v17 = vstv %s917_s28  ;;  %v116_v20 = vrot.slane %v114_v12, 4  ;;  %s969_s2 = sld [smem:[#allocation3 + $0x282]]  ;;  %v156_v34 = vrot.slane %v154_v28, 1  ;;  %s1001_s4 = sld [smem:[#allocation3 + $0x183]] }
  0x4c   :  { %v123_v21 = vrot.slane %v121_v13, 5  ;;  %v135_v22 = vmul.f32 %v134_v17, %v922_v0  ;;  %v104_v25 = vadd.f32 %v102_v15, %v97_v18  ;;  %v168_v36 = vmul.f32 %v167_v30, %v922_v0  ;;  %s977_s18 = sld [smem:[#allocation3 + $0x302]]  ;;  %s1007_s24 = sld [smem:[#allocation3 + $0x203]] }
  0x4d   :  { %v130_v26 = vrot.slane %v128_v16, 6  ;;  %v175_v37 = vmul.f32 %v174_v31, %v922_v0  ;;  %v182_v38 = vmul.f32 %v181_v32, %v922_v0  ;;  %v188_v39 = vstv %s940_s11  ;;  %s981_s19 = sld [smem:[#allocation3 + $0x382]]  ;;  %s1009_s25 = sld [smem:[#allocation3 + $0x283]] }
  0x4e   :  { %v111_v33 = vadd.f32 %v109_v19, %v104_v25  ;;  %v195_v40 = vstv %s942_s12  ;;  %v158_v42 = vadd.f32 %v156_v34, %v151_v27  ;;  %v163_v43 = vrot.slane %v161_v35, 2  ;;  %s1011_s26 = sld [smem:[#allocation3 + $0x303]]  ;;  %s1016_s27 = sld [smem:[#allocation6 + $0x2]] }
  0x4f   :  { %v170_v44 = vrot.slane %v168_v36, 3  ;;  %v137_v45 = vrot.slane %v135_v22, 7  ;;  %v141_v46 = vstv %s948_s13  ;;  %v177_v47 = vrot.slane %v175_v37, 4  ;;  %s1018_s28 = sld [smem:[#allocation3 + $0x383]]  ;;  %s1023_s29 = sld [smem:[#allocation3 + $0x4]] }
  0x50   :  { %v118_v41 = vadd.f32 %v116_v20, %v111_v33  ;;  %v189_v48 = vmul.f32 %v188_v39, %v922_v0  ;;  %v165_v50 = vadd.f32 %v163_v43, %v158_v42  ;;  %v184_v51 = vrot.slane %v182_v38, 5  ;;  %s1025_s30 = sld [smem:[#allocation3 + $0x84]]  ;;  %s1054_s11 = sld [smem:[#allocation6 + $0x3]] }
  0x51   :  { %v211_v52 = vstv %s950_s14  ;;  %v196_v54 = vmul.f32 %v195_v40, %v922_v0  ;;  %v214_v56 = vstv %s955_s15  ;;  %v221_v60 = vstv %s959_s16  ;;  %s1031_s8 = sld [smem:[#allocation3 + $0x104]]  ;;  %s1061_s12 = sld [smem:[#allocation3 + $0x5]] }
  0x52   :  { %v125_v49 = vadd.f32 %v123_v21, %v118_v41  ;;  %v191_v53 = vrot.slane %v189_v48, 6  ;;  %v212_v55 = vmul.f32 %v211_v52, %v922_v0  ;;  %v172_v58 = vadd.f32 %v170_v44, %v165_v50  ;;  %s1035_s9 = sld [smem:[#allocation3 + $0x184]]  ;;  %s1065_s13 = sld [smem:[#allocation3 + $0x85]] }
  0x53   :  { %v215_v59 = vmul.f32 %v214_v56, %v922_v0  ;;  %v222_v61 = vmul.f32 %v221_v60, %v922_v0  ;;  %v228_v62 = vstv %s961_s17  ;;  %v235_v63 = vstv %s967_s0  ;;  %s1040_s1 = sld [smem:[#allocation3 + $0x204]]  ;;  %s1067_s14 = sld [smem:[#allocation3 + $0x105]] }
  0x54   :  { %v132_v57 = vadd.f32 %v130_v26, %v125_v49  ;;  %v242_v1 = vstv %s969_s2  ;;  %v179_v3 = vadd.f32 %v177_v47, %v172_v58  ;;  %v229_v5 = vmul.f32 %v228_v62, %v922_v0  ;;  %s1042_s3 = sld [smem:[#allocation3 + $0x284]]  ;;  %s1072_s15 = sld [smem:[#allocation3 + $0x185]] }
  0x55   :  { %v217_v4 = vrot.slane %v215_v59, 1  ;;  %v224_v6 = vrot.slane %v222_v61, 2  ;;  %v236_v7 = vmul.f32 %v235_v63, %v922_v0  ;;  %v243_v8 = vmul.f32 %v242_v1, %v922_v0  ;;  %s1048_s10 = sld [smem:[#allocation3 + $0x304]]  ;;  %s1074_s16 = sld [smem:[#allocation3 + $0x205]] }
  0x56   :  { %v139_v2 = vadd.f32 %v137_v45, %v132_v57  ;;  %v249_v9 = vstv %s977_s18  ;;  %v186_v10 = vadd.f32 %v184_v51, %v179_v3  ;;  %v198_v11 = vrot.slane %v196_v54, 7  ;;  %s1051_s6 = sld [smem:[#allocation3 + $0x384]]  ;;  %s1079_s17 = sld [smem:[#allocation3 + $0x285]] }
  0x57   :  { %v219_v12 = vadd.f32 %v217_v4, %v212_v55  ;;  %v231_v13 = vrot.slane %v229_v5, 3  ;;  %v250_v14 = vmul.f32 %v249_v9, %v922_v0  ;;  %v256_v15 = vstv %s981_s19  ;;  %s1083_s0 = sld [smem:[#allocation6 + $0x4]]  ;;  %s1085_s2 = sld [smem:[#allocation3 + $0x305]] }
  0x58   :  { %v193_v16 = vadd.f32 %v191_v53, %v186_v10  ;;  %v202_v17 = vstv %s983_s20  ;;  %v238_v19 = vrot.slane %v236_v7, 4  ;;  %v142_v20 = vadd.f32 %v141_v46, %v139_v2  ;;  %s1089_s18 = sld [smem:[#allocation3 + $0x385]]  ;;  %s1108_s20 = sld [smem:[#allocation8]] }
  0x59   :  { %v226_v18 = vadd.f32 %v224_v6, %v219_v12  ;;  %v245_v21 = vrot.slane %v243_v8, 5  ;;  %v272_v22 = vstv %s989_s21  ;;  %v275_v23 = vstv %s991_s22  ;;  %s680_s19 = sld [smem:[#allocation6 + $0x5]]  ;;  %s1110_s21 = sld [smem:[#allocation8 + $0x80]] }
  0x5a   :  { %v200_v24 = vadd.f32 %v198_v11, %v193_v16  ;;  %v252_v26 = vrot.slane %v250_v14, 6  ;;  %v257_v27 = vmul.f32 %v256_v15, %v922_v0  ;;  %v273_v28 = vmul.f32 %v272_v22, %v922_v0  ;;  %s1112_s22 = sld [smem:[#allocation8 + $0x1]] }
  0x5b   :  { %v233_v25 = vadd.f32 %v231_v13, %v226_v18  ;;  %v276_v29 = vmul.f32 %v275_v23, %v922_v0  ;;  %v282_v30 = vstv %s999_s23  ;;  %v289_v31 = vstv %s1001_s4  ;;  %s1114_s23 = sld [smem:[#allocation8 + $0x81]]  ;;  %s1116_s4 = sld [smem:[#allocation8 + $0x2]] }
  0x5c   :  { %v203_v32 = vadd.f32 %v202_v17, %v200_v24  ;;  %v283_v34 = vmul.f32 %v282_v30, %v922_v0  ;;  %v290_v35 = vmul.f32 %v289_v31, %v922_v0  ;;  %v631_v36 = vmul.f32 -1.442695, %v142_v20 }
  0x5d   :  { %v240_v33 = vadd.f32 %v238_v19, %v233_v25  ;;  %v278_v37 = vrot.slane %v276_v29, 1  ;;  %v296_v38 = vstv %s1007_s24  ;;  %v303_v39 = vstv %s1009_s25  ;;  %s1118_s24 = sld [smem:[#allocation8 + $0x82]]  ;;  %s1120_s25 = sld [smem:[#allocation8 + $0x3]] }
  0x5e   :  { %v259_v41 = vrot.slane %v257_v27, 7  ;;  %v285_v42 = vrot.slane %v283_v34, 2  ;;  %v310_v43 = vstv %s1011_s26  ;;  %v292_v45 = vrot.slane %v290_v35, 3  ;;  %s1122_s26 = sld [smem:[#allocation8 + $0x83]] }
  0x5f   :  { %v247_v40 = vadd.f32 %v245_v21, %v240_v33  ;;  %v280_v44 = vadd.f32 %v278_v37, %v273_v28  ;;  %v297_v46 = vmul.f32 %v296_v38, %v922_v0  ;;  %v304_v47 = vmul.f32 %v303_v39, %v922_v0 }
  0x60   :  { %v641_v48 = vmul.f32 -1.442695, %v203_v32  ;;  %v263_v50 = vstv %s1016_s27  ;;  %v317_v51 = vstv %s1018_s28  ;;  %v311_v55 = vmul.f32 %v310_v43, %v922_v0  ;;  %s1124_s27 = sld [smem:[#allocation8 + $0x100]]  ;;  %s1126_s28 = sld [smem:[#allocation8 + $0x101]] }
  0x61   :  { %v254_v49 = vadd.f32 %v252_v26, %v247_v40  ;;  %v287_v52 = vadd.f32 %v285_v42, %v280_v44  ;;  %v299_v53 = vrot.slane %v297_v46, 4  ;;  %v306_v54 = vrot.slane %v304_v47, 5 }
  0x62   :  { %v318_v57 = vmul.f32 %v317_v51, %v922_v0  ;;  %v333_v58 = vstv %s1023_s29  ;;  %v336_v59 = vstv %s1025_s30  ;;  %v343_v63 = vstv %s1031_s8  ;;  %s1128_s29 = sld [smem:[#allocation8 + $0x102]]  ;;  %s1130_s30 = sld [smem:[#allocation8 + $0x103]] }
  0x63   :  { %v261_v56 = vadd.f32 %v259_v41, %v254_v49  ;;  %v294_v60 = vadd.f32 %v292_v45, %v287_v52  ;;  %v334_v61 = vmul.f32 %v333_v58, %v922_v0  ;;  %v337_v62 = vmul.f32 %v336_v59, %v922_v0  ;;  %s1138_s8 = sld [smem:[#allocation8 + $0x180]] }
  0x64   :  { %722 = vpow2.f32 %v631_v36  ;;  %v344_v2 = vmul.f32 %v343_v63, %v922_v0  ;;  %v350_v3 = vstv %s1035_s9  ;;  %v313_v5 = vrot.slane %v311_v55, 6  ;;  %s1140_s9 = sld [smem:[#allocation8 + $0x181]] }
  0x65   :  { %v264_v1 = vadd.f32 %v263_v50, %v261_v56  ;;  %v301_v4 = vadd.f32 %v299_v53, %v294_v60  ;;  %v339_v6 = vrot.slane %v337_v62, 1  ;;  %v351_v7 = vmul.f32 %v350_v3, %v922_v0 }
  0x66   :  { %724 = vpow2.f32 %v641_v48  ;;  %v346_v8 = vrot.slane %v344_v2, 2  ;;  %v357_v9 = vstv %s1040_s1  ;;  %v364_v10 = vstv %s1042_s3  ;;  %s1144_s1 = sld [smem:[#allocation8 + $0x182]]  ;;  %s1146_s3 = sld [smem:[#allocation8 + $0x183]] }
  0x67   :  { %v308_v11 = vadd.f32 %v306_v54, %v301_v4  ;;  %v320_v12 = vrot.slane %v318_v57, 7  ;;  %v341_v13 = vadd.f32 %v339_v6, %v334_v61  ;;  %v353_v14 = vrot.slane %v351_v7, 3 }
  0x68   :  { %v651_v15 = vmul.f32 -1.442695, %v264_v1  ;;  %v358_v16 = vmul.f32 %v357_v9, %v922_v0  ;;  %v365_v17 = vmul.f32 %v364_v10, %v922_v0  ;;  %v371_v18 = vstv %s1048_s10  ;;  %s1152_s10 = sld [smem:[#allocation8 + $0x200]] }
  0x69   :  { %v315_v19 = vadd.f32 %v313_v5, %v308_v11  ;;  %v348_v20 = vadd.f32 %v346_v8, %v341_v13  ;;  %v372_v21 = vmul.f32 %v371_v18, %v922_v0  ;;  %v378_v22 = vstv %s1051_s6  ;;  %s1154_s6 = sld [smem:[#allocation8 + $0x201]] }
  0x6a   :  { %v324_v23 = vstv %s1054_s11  ;;  %v360_v24 = vrot.slane %v358_v16, 4  ;;  %v367_v27 = vrot.slane %v365_v17, 5  ;;  %v379_v28 = vmul.f32 %v378_v22, %v922_v0  ;;  %s1156_s11 = sld [smem:[#allocation8 + $0x202]] }
  0x6b   :  { %v322_v25 = vadd.f32 %v320_v12, %v315_v19  ;;  %v355_v26 = vadd.f32 %v353_v14, %v348_v20  ;;  %726 = vpow2.f32 %v651_v15  ;;  %v394_v29 = vstv %s1061_s12  ;;  %s1158_s12 = sld [smem:[#allocation8 + $0x203]] }
  0x6c   :  { %v397_v30 = vstv %s1065_s13  ;;  %v404_v31 = vstv %s1067_s14  ;;  %v374_v34 = vrot.slane %v372_v21, 6  ;;  %v395_v35 = vmul.f32 %v394_v29, %v922_v0  ;;  %s1164_s13 = sld [smem:[#allocation8 + $0x280]]  ;;  %s1166_s14 = sld [smem:[#allocation8 + $0x281]] }
  0x6d   :  { %v325_v32 = vadd.f32 %v324_v23, %v322_v25  ;;  %v362_v33 = vadd.f32 %v360_v24, %v355_v26  ;;  %v398_v37 = vmul.f32 %v397_v30, %v922_v0  ;;  %v405_v38 = vmul.f32 %v404_v31, %v922_v0 }
  0x6e   :  { %v723_v36 = vpop.eup %722  ;;  %v411_v39 = vstv %s1072_s15  ;;  %v418_v40 = vstv %s1074_s16  ;;  %v381_v43 = vrot.slane %v379_v28, 7  ;;  %v425_v49 = vstv %s1079_s17  ;;  %s1168_s15 = sld [smem:[#allocation8 + $0x282]]  ;;  %s709_s16 = sld [smem:[#allocation8 + $0x283]] }
  0x6f   :  { %v661_v41 = vmul.f32 -1.442695, %v325_v32  ;;  %v369_v42 = vadd.f32 %v367_v27, %v362_v33  ;;  %v412_v44 = vmul.f32 %v411_v39, %v922_v0  ;;  %v400_v46 = vrot.slane %v398_v37, 1  ;;  %s1174_s17 = sld [smem:[#allocation9]] }
  0x70   :  { %v725_v45 = vpop.eup %724  ;;  %v407_v47 = vrot.slane %v405_v38, 2  ;;  %v419_v48 = vmul.f32 %v418_v40, %v922_v0  ;;  %v385_v51 = vstv %s1083_s0  ;;  %v432_v52 = vstv %s1085_s2  ;;  %s1176_s0 = sld [smem:[#allocation9 + $0x1]]  ;;  %s702_s2 = sld [smem:[#allocation9 + $0x2]] }
  0x71   :  { %v376_v50 = vadd.f32 %v374_v34, %v369_v42  ;;  %728 = vpow2.f32 %v661_v41  ;;  %v402_v53 = vadd.f32 %v400_v46, %v395_v35  ;;  %v414_v54 = vrot.slane %v412_v44, 3 }
  0x72   :  { %v426_v55 = vmul.f32 %v425_v49, %v922_v0  ;;  %v146_v56 = vadd.f32 1.0, %v723_v36  ;;  %v439_v58 = vstv %s1089_s18  ;;  %v207_v59 = vadd.f32 1.0, %v725_v45  ;;  %s710_s18 = sld [smem:[#allocation9 + $0x3]] }
  0x73   :  { %v383_v57 = vadd.f32 %v381_v43, %v376_v50  ;;  %v409_v60 = vadd.f32 %v407_v47, %v402_v53  ;;  %v421_v61 = vrot.slane %v419_v48, 4  ;;  %v433_v62 = vmul.f32 %v432_v52, %v922_v0 }
  0x74   :  { %v428_v3 = vrot.slane %v426_v55, 5  ;;  %v440_v4 = vmul.f32 %v439_v58, %v922_v0  ;;  %730 = vrcp.f32 %v146_v56  ;;  %v446_v0 = vstv %s680_s19  ;;  %s582_s19 = sld [smem:[#allocation11]] }
  0x75   :  { %v386_v63 = vadd.f32 %v385_v51, %v383_v57  ;;  %v727_v1 = vpop.eup %726  ;;  %v416_v2 = vadd.f32 %v414_v54, %v409_v60  ;;  %732 = vrcp.f32 %v207_v59  ;;  %v435_v7 = vrot.slane %v433_v62, 6 }
  0x76   :  { %v268_v8 = vadd.f32 1.0, %v727_v1  ;;  %v442_v10 = vrot.slane %v440_v4, 7  ;;  %v455_v20 = vstv %s1108_s20  ;;  %v458_v21 = vstv %s1110_s21  ;;  %s712_s20 = sld [smem:[#allocation11 + $0x80]] }
  0x77   :  { %v671_v5 = vmul.f32 -1.442695, %v386_v63  ;;  %v423_v6 = vadd.f32 %v421_v61, %v416_v2  ;;  %v487_v22 = vstv %s1112_s22  ;;  %v490_v23 = vstv %s1114_s23  ;;  %s713_s21 = sld [smem:[#allocation11 + $0x100]] }
  0x78   :  { %v519_v24 = vstv %s1116_s4  ;;  %v522_v25 = vstv %s1118_s24  ;;  %v551_v27 = vstv %s1120_s25  ;;  %v554_v28 = vstv %s1122_s26  ;;  %s714_s22 = sld [smem:[#allocation11 + $0x180]]  ;;  %s861_s24 = smov [#allocation12]  }
  0x79   :  { %734 = vpow2.f32 %v671_v5  ;;  %v430_v9 = vadd.f32 %v428_v3, %v423_v6  ;;  %v462_v36 = vstv %s1124_s27  ;;  %v494_v39 = vstv %s1126_s28  ;;  %s613_s25 = sshll.u32 %s861_s24, 4  ;;  %s614_s25 = int_to_ptr.vmem [resolvable:$true] %s613_s25 }
  0x7a   :  { %736 = vrcp.f32 %v268_v8  ;;  %v526_v40 = vstv %s1128_s29  ;;  %v558_v41 = vstv %s1130_s30  ;;  %v466_v51 = vstv %s1138_s8  ;;  %s826_s26 = scalar_lea.vmem %s614_s25, 16  ;;  %s830_s27 = scalar_lea.vmem %s614_s25, 32 }
  0x7b   :  { %v729_v11 = vpop.eup %728  ;;  %v437_v12 = vadd.f32 %v435_v7, %v430_v9  ;;  %v498_v53 = vstv %s1140_s9  ;;  %v530_v54 = vstv %s1144_s1  ;;  %v562_v55 = vstv %s1146_s3  ;;  %p827_p11 = scmp.ne.s32.totalorder %s614_s25, %s826_s26  ;;  %p831_p12 = scmp.lt.s32.totalorder %s614_s25, %s614_s25 }
  0x7c   :  { %v329_v14 = vadd.f32 1.0, %v729_v11  ;;  %v470_v3 = vstv %s1152_s10  ;;  %v502_v4 = vstv %s1154_s6  ;;  %v534_v5 = vstv %s1156_s11  ;;  %p832_p13 = scmp.lt.s32.totalorder %s830_s27, %s826_s26 }
  0x7d   :  { %v444_v13 = vadd.f32 %v442_v10, %v437_v12  ;;  %v566_v6 = vstv %s1158_s12 }
  0x7e   :  { %v731_v16 = vpop.eup %730  ;;  %738 = vrcp.f32 %v329_v14  ;;  %v474_v14 = vstv %s1164_s13  ;;  %p833_p0 = por %p832_p13, %p831_p12 }
  0x7f   :  { %v447_v15 = vadd.f32 %v446_v0, %v444_v13  ;;  %v733_v17 = vpop.eup %732  ;;  %v456_v29 = vmul.f32 %v731_v16, %v455_v20  ;;  %v488_v31 = vmul.f32 %v731_v16, %v487_v22  ;;  %v520_v33 = vmul.f32 %v731_v16, %v519_v24 }
  0x80   :  { %v459_v30 = vmul.f32 %v733_v17, %v458_v21  ;;  %v491_v32 = vmul.f32 %v733_v17, %v490_v23  ;;  %v523_v34 = vmul.f32 %v733_v17, %v522_v25  ;;  %v552_v37 = vmul.f32 %v731_v16, %v551_v27  ;;  %p834_p1 = pnand %p833_p0, %p827_p11 }
  0x81   :  { %v681_v18 = vmul.f32 -1.442695, %v447_v15  ;;  %v555_v38 = vmul.f32 %v733_v17, %v554_v28  ;;  %v506_v15 = vstv %s1166_s14  ;;  %v538_v16 = vstv %s1168_s15 }
  0x82   :  { %v460_v42 = vadd.f32 %v459_v30, %v456_v29  ;;  %v492_v44 = vadd.f32 %v491_v32, %v488_v31  ;;  %v524_v45 = vadd.f32 %v523_v34, %v520_v33  ;;  %v570_v17 = vstv %s709_s16 }
  0x83   :  { %v735_v19 = vpop.eup %734  ;;  %740 = vpow2.f32 %v681_v18  ;;  %v556_v48 = vadd.f32 %v555_v38, %v552_v37  ;;  %v478_v27 = vstv %s1174_s17  ;;  %v510_v28 = vstv %s1176_s0 }
  0x84   :  { %v390_v26 = vadd.f32 1.0, %v735_v19  ;;  %v737_v35 = vpop.eup %736  ;;  %v542_v29 = vstv %s702_s2  ;;  %v574_v30 = vstv %s710_s18 }
  0x85   :  { %v463_v43 = vmul.f32 %v737_v35, %v462_v36  ;;  %v495_v46 = vmul.f32 %v737_v35, %v494_v39  ;;  %v527_v47 = vmul.f32 %v737_v35, %v526_v40  ;;  %v559_v49 = vmul.f32 %v737_v35, %v558_v41 }
  0x86   :  { %742 = vrcp.f32 %v390_v26 }
  0x87   :  { %v464_v57 = vadd.f32 %v463_v43, %v460_v42  ;;  %v496_v59 = vadd.f32 %v495_v46, %v492_v44  ;;  %v528_v60 = vadd.f32 %v527_v47, %v524_v45  ;;  %v560_v61 = vadd.f32 %v559_v49, %v556_v48 }
  0x88   :  { %v739_v50 = vpop.eup %738 }
  0x89   :  { %v467_v58 = vmul.f32 %v739_v50, %v466_v51  ;;  %v499_v62 = vmul.f32 %v739_v50, %v498_v53  ;;  %v531_v63 = vmul.f32 %v739_v50, %v530_v54  ;;  %v563_v1 = vmul.f32 %v739_v50, %v562_v55 }
  0x8a   :  { %v583_v51 = vstv %s582_s19  ;;  %v590_v54 = vstv %s713_s21 }
  0x8b   :  { %v468_v7 = vadd.f32 %v467_v58, %v464_v57  ;;  %v500_v8 = vadd.f32 %v499_v62, %v496_v59  ;;  %v532_v9 = vadd.f32 %v531_v63, %v528_v60  ;;  %v564_v10 = vadd.f32 %v563_v1, %v560_v61 }
  0x8c   :  { %v594_v57 = vstv %s714_s22 }
  0x8d   :  { %v741_v52 = vpop.eup %740 }
  0x8e   :  { %v451_v56 = vadd.f32 1.0, %v741_v52  ;;  %v586_v52 = vstv %s712_s20 }
  0x90   :  { %744 = vrcp.f32 %v451_v56  ;;  %v743_v2 = vpop.eup %742 }
  0x91   :  { %v471_v11 = vmul.f32 %v743_v2, %v470_v3  ;;  %v503_v12 = vmul.f32 %v743_v2, %v502_v4  ;;  %v535_v0 = vmul.f32 %v743_v2, %v534_v5  ;;  %v567_v13 = vmul.f32 %v743_v2, %v566_v6 }
  0x92   :  { %v598_v2 = vstv %s1203_s5 }
  0x93   :  { %v472_v18 = vadd.f32 %v471_v11, %v468_v7  ;;  %v504_v19 = vadd.f32 %v503_v12, %v500_v8  ;;  %v536_v20 = vadd.f32 %v535_v0, %v532_v9  ;;  %v568_v21 = vadd.f32 %v567_v13, %v564_v10 }
  0x9a   :  { %v745_v22 = vpop.eup %744 }
  0x9b   :  { %v475_v23 = vmul.f32 %v745_v22, %v474_v14  ;;  %v507_v24 = vmul.f32 %v745_v22, %v506_v15  ;;  %v539_v25 = vmul.f32 %v745_v22, %v538_v16  ;;  %v571_v26 = vmul.f32 %v745_v22, %v570_v17 }
  0x9d   :  { %v476_v31 = vadd.f32 %v475_v23, %v472_v18  ;;  %v508_v32 = vadd.f32 %v507_v24, %v504_v19  ;;  %v540_v33 = vadd.f32 %v539_v25, %v536_v20  ;;  %v572_v34 = vadd.f32 %v571_v26, %v568_v21 }
  0x9f   :  { %v479_v35 = vadd.f32 %v478_v27, %v476_v31  ;;  %v511_v36 = vadd.f32 %v510_v28, %v508_v32  ;;  %v543_v37 = vadd.f32 %v542_v29, %v540_v33  ;;  %v575_v38 = vadd.f32 %v574_v30, %v572_v34 }
  0xa1   :  { %v687_v39 = vmul.f32 -1.442695, %v479_v35  ;;  %v695_v40 = vmul.f32 -1.442695, %v511_v36  ;;  %v703_v41 = vmul.f32 -1.442695, %v543_v37 }
  0xa2   :  { %v711_v42 = vmul.f32 -1.442695, %v575_v38 }
  0xa3   :  { %746 = vpow2.f32 %v687_v39 }
  0xa4   :  { %748 = vpow2.f32 %v695_v40 }
  0xa5   :  { %750 = vpow2.f32 %v703_v41 }
  0xa6   :  { %752 = vpow2.f32 %v711_v42 }
  0xad   :  { %v747_v43 = vpop.eup %746 }
  0xae   :  { %v749_v44 = vpop.eup %748  ;;  %v483_v45 = vadd.f32 1.0, %v747_v43 }
  0xaf   :  { %v751_v46 = vpop.eup %750  ;;  %v515_v47 = vadd.f32 1.0, %v749_v44 }
  0xb0   :  { %v753_v48 = vpop.eup %752  ;;  %754 = vrcp.f32 %v483_v45  ;;  %v547_v49 = vadd.f32 1.0, %v751_v46 }
  0xb1   :  { %756 = vrcp.f32 %v515_v47  ;;  %v579_v50 = vadd.f32 1.0, %v753_v48 }
  0xb2   :  { %758 = vrcp.f32 %v547_v49 }
  0xb3   :  { %760 = vrcp.f32 %v579_v50 }
  0xba   :  { %v755_v53 = vpop.eup %754 }
  0xbb   :  { %v757_v55 = vpop.eup %756  ;;  %v584_v56 = vmul.f32 %v755_v53, %v583_v51 }
  0xbc   :  { %v759_v58 = vpop.eup %758  ;;  %v587_v59 = vmul.f32 %v757_v55, %v586_v52 }
  0xbd   :  { %v761_v60 = vpop.eup %760  ;;  %v591_v61 = vmul.f32 %v759_v58, %v590_v54 }
  0xbe   :  { %v588_v62 = vadd.f32 %v587_v59, %v584_v56  ;;  %v595_v63 = vmul.f32 %v761_v60, %v594_v57 }
  0xc0   :  { %v592_v1 = vadd.f32 %v591_v61, %v588_v62 }
  0xc2   :  { %v596_v3 = vadd.f32 %v595_v63, %v592_v1 }
  0xc4   :  { %v599_v4 = vadd.f32 %v598_v2, %v596_v3 }
  0xc6   :  { %v715_v5 = vmul.f32 -1.442695, %v599_v4 }
  0xc8   :  { %762 = vpow2.f32 %v715_v5 }
  0xd2   :  { %v763_v6 = vpop.eup %762 }
  0xd3   :  { %v603_v7 = vadd.f32 1.0, %v763_v6 }
  0xd5   :  { %764 = vrcp.f32 %v603_v7 }
  0xdf   :  { %v765_v8 = vpop.eup %764 }
  0xe0   :  { %606 = vst [vmem:[#allocation12] sm:$0x1] %v765_v8 }
  0xe1   :  { %837 = shalt.err (!%p834_p1)
}
  0xe2   :  { %s838_s29 = scalar_lea.hbm %s1205_s7, 16 }
  0xe3   :  { %p839_p2 = scmp.ne.s32.totalorder %s1205_s7, %s838_s29  ;;  %p842_p3 = scmp.lt.u32.totalorder %s838_s29, %s1205_s7 }
  0xe5   :  { %p844_p4 = pnand %p842_p3, %p839_p2 }
  0xe7   :  { %847 = shalt.err (!%p844_p4)
}
  0xe8   :  { %616 = dma.vmem_to_hbm [thread:$0]  %s614_s25, 16, %s1205_s7, [#allocation4]  }
  0xe9   :  { %854 = dma.done.wait [#allocation4], 16  }
  0xea   :  { %855 = vsyncadd [#allocation4], 4294967280 }
  0xeb   :  { %620 = vsyncpa [#allocation4], 1 }
  0xec   :  { %621 = vsyncpa [#allocation5], 1 }
  0xed   :  { %622 = vsyncpa [#allocation7], 1 }
  0xee   :  { %623 = vsyncpa [#allocation10], 1 }

</bundles_post_ra>
